<compile_context>
chip_gen: v6e
topology: v6e:2x2x1
jax: 0.10.0
libtpu: 0.0.40
codegen_flags: <defaults>
</compile_context>

<pallas_src>
import jax
import jax.numpy as jnp
from jax import lax
from jax.experimental import pallas as pl
from jax.experimental.pallas import tpu as pltpu

_LANE = 128
_LAYER_DIMS = [64, 32, 16, 8, 1]          # fc1..fc5 output widths
_VMEM_TILE_BUDGET = 20 << 20              # VMEM bytes the batch tile may occupy


def _cdiv(a, b):
    return -(-a // b)


def _round_up(v, m):
    return _cdiv(v, m) * m


def _num_tensorcores():
    """Best-effort TensorCores per device: 2 on v7x (and v4/v5p megacore),
    1 on v5e/v6e.  Used only to shape the grid, never for correctness."""
    try:
        kind = jax.devices()[0].device_kind.lower()
    except Exception:
        return 1
    return 2 if any(tag in kind for tag in ("7", "v4", "v5p")) else 1


def _choose_tiling(n, tile_b, tile_cap, num_tc):
    """Pick (tile, num_tiles) for the batch axis.

    Large tiles amortize the ~0.35us per-grid-step overhead.  On 2-TC chips
    (v7x) keep the step count even so dimension_semantics=("parallel",) gives
    both cores equal work; on single-TC chips (v5e/v6e) never split a batch
    that already fits in one tile.
    """
    tile = max(_LANE, min(_round_up(tile_b, _LANE), tile_cap, _round_up(n, _LANE)))
    num_tiles = _cdiv(n, tile)
    if num_tc > 1 and n > _LANE and num_tiles % 2 != 0:
        num_tiles += 1
        tile = max(_LANE, min(_round_up(_cdiv(n, num_tiles), _LANE), tile_cap))
        num_tiles = _cdiv(n, tile)
    return tile, num_tiles


def _dnn5_kernel(x_ref,
                 w1_ref, b1_ref, w2_ref, b2_ref, w3_ref, b3_ref,
                 w4_ref, b4_ref, w5t_ref, b5_ref,
                 o_ref):
    """Fused DNN5 forward for one batch tile (batch ends up on the lane axis).

    x_ref : [tile_b, in_feat]   natural [N, F] layout straight from HBM
    wK    : [out_k, in_k]       MXU dtype (bf16 by default)
    bK    : [out_k, 1]          f32, broadcast along lanes
    w5t   : [8, 1]              f32 (fc5 done on VPU/XLU, off the MXU)
    b5    : [1, 1]              f32
    o_ref : [1, tile_b]         lane-dense f32 store
    """
    mxu_dt = w1_ref.dtype
    x = x_ref[...]
    if x.dtype != mxu_dt:
        x = x.astype(mxu_dt)

    # fc1: contract the last (in_feat) dims of W1 and x -> [64, tile_b].  The
    # batch->lane transpose is folded into the MXU contraction instead of a
    # wrapper-side XLA transpose + pad of the activations.
    h = lax.dot_general(w1_ref[...], x, (((1,), (1,)), ((), ())),
                        preferred_element_type=jnp.float32)
    h = jnp.maximum(h + b1_ref[...], 0.0)

    # fc2..fc4: batch stays on the 128-lane axis; bias add + ReLU are
    # lane-dense f32 VPU work; accumulation stays f32.
    for w_ref, b_ref in ((w2_ref, b2_ref), (w3_ref, b3_ref), (w4_ref, b4_ref)):
        h = jnp.dot(w_ref[...], h.astype(mxu_dt),
                    preferred_element_type=jnp.float32)
        h = jnp.maximum(h + b_ref[...], 0.0)

    # fc5 (out=1, K=8): per-lane weighted sublane reduction on VPU/XLU instead
    # of an M=1 MXU matmul (saves a weight load + result drain per lane slab).
    out = jnp.sum(h * w5t_ref[...], axis=0, keepdims=True) + b5_ref[...]
    o_ref[...] = out.astype(o_ref.dtype)


def dnn5_forward(x, params, *, tile_b=8192, mxu_dtype=jnp.bfloat16):
    """DNN5 forward (dropstate=False semantics).

    x        : [N, in_feat] float array; streamed as-is (no transpose/pad in HBM).
    params   : dict name -> (w [out, in], b [out]) in PyTorch nn.Linear layout.
    mxu_dtype: matmul-operand dtype (bf16 default: ~3x fewer MXU passes, f32
               accumulation; pass jnp.float32 for strict accuracy).
    Returns [N, 1] float32.
    """
    n, in_feat = x.shape

    # ---- params: weights in MXU dtype, biases f32 as [out, 1] lane-broadcast columns.
    flat = []
    for name in ("fc1", "fc2", "fc3", "fc4"):
        w, b = params[name]
        flat.append(jnp.asarray(w).astype(mxu_dtype))
        flat.append(jnp.asarray(b, jnp.float32).reshape(-1, 1))
    w5, b5 = params["fc5"]
    flat.append(jnp.asarray(w5, jnp.float32).reshape(1, 8).T)    # [8, 1] for fc5-on-VPU
    flat.append(jnp.asarray(b5, jnp.float32).reshape(1, 1))

    # ---- batch tile: as large as the VMEM budget allows (amortizes step overhead).
    x_isz = jnp.dtype(x.dtype).itemsize
    bytes_per_col = (2 * in_feat * x_isz                        # double-buffered input
                     + in_feat * jnp.dtype(mxu_dtype).itemsize  # in-kernel cast of x
                     + 1024                                     # layer intermediates
                     + 2 * 4)                                   # double-buffered output
    tile_cap = max(_LANE, (_VMEM_TILE_BUDGET // bytes_per_col) // _LANE * _LANE)
    tile, num_tiles = _choose_tiling(n, tile_b, tile_cap, _num_tensorcores())

    param_bytes = sum(int(a.size) * jnp.dtype(a.dtype).itemsize for a in flat)
    est_vmem = bytes_per_col * tile + 2 * param_bytes + (2 << 20)
    # Raise v5e's 16 MiB scoped default; stay well under v7x's 64 MiB physical.
    vmem_limit = int(min(max(32 << 20, est_vmem + (16 << 20)), 48 << 20))

    # Constant (weight/bias) blocks: loaded once, block index never changes.
    # (pipeline_mode=pl.Buffered(1) could drop their double-buffers; skipped as a
    #  micro-opt -- all params together are <6 KB.)
    def const_spec(a):
        return pl.BlockSpec(a.shape, lambda i: (0, 0))

    in_specs = [pl.BlockSpec((tile, in_feat), lambda i: (i, 0))]
    in_specs += [const_spec(a) for a in flat]

    flops = 2 * n * (in_feat * 64 + 64 * 32 + 32 * 16 + 16 * 8 + 8 * 1)
    bytes_accessed = n * in_feat * x_isz + n * 4 + param_bytes

    out = pl.pallas_call(
        _dnn5_kernel,
        out_shape=jax.ShapeDtypeStruct((1, n), jnp.float32),
        grid=(num_tiles,),
        in_specs=in_specs,
        out_specs=pl.BlockSpec((1, tile), lambda i: (0, i)),
        compiler_params=pltpu.CompilerParams(
            dimension_semantics=("parallel",),
            vmem_limit_bytes=vmem_limit),
        cost_estimate=pl.CostEstimate(
            flops=int(flops), transcendentals=0,
            bytes_accessed=int(bytes_accessed)),
    )(x, *flat)

    return out.reshape(n, 1)      # [1, N] -> [N, 1] is layout-preserving


def init_dnn5_params(key, in_feat_num):
    """nn.Linear-style init U[-1/sqrt(fan_in), +1/sqrt(fan_in)], PyTorch layout."""
    fan_ins = [in_feat_num] + _LAYER_DIMS[:-1]
    names = ["fc1", "fc2", "fc3", "fc4", "fc5"]
    params = {}
    for name, fan_in, fan_out in zip(names, fan_ins, _LAYER_DIMS):
        key, kw, kb = jax.random.split(key, 3)
        bound = float(fan_in) ** -0.5
        w = jax.random.uniform(kw, (fan_out, fan_in), jnp.float32, -bound, bound)
        b = jax.random.uniform(kb, (fan_out,), jnp.float32, -bound, bound)
        params[name] = (w, b)
    return params


def dnn5_reference(x, params):
    """Pure-JAX reference (matches the PyTorch forward with dropstate=False)."""
    h = x
    for name in ("fc1", "fc2", "fc3", "fc4"):
        w, b = params[name]
        h = jnp.maximum(h @ w.T + b, 0.0)
    w, b = params["fc5"]
    return h @ w.T + b


if __name__ == "__main__":
    key = jax.random.PRNGKey(0)
    key, kx, kp, kx2 = jax.random.split(key, 4)

    batch = 16
    in_feat_num = 32
    x = jax.random.normal(kx, (batch, in_feat_num), jnp.float32)
    params = init_dnn5_params(kp, in_feat_num)
    ref = dnn5_reference(x, params)

    # Default path: bf16 MXU operands, f32 accumulation / bias / ReLU.
    out = jax.block_until_ready(dnn5_forward(x, params))
    assert out.shape == (batch, 1), out.shape
    assert jnp.allclose(out, ref, atol=5e-2, rtol=5e-2), (
        f"bf16 max abs err = {jnp.max(jnp.abs(out - ref))}"
    )

    # Strict f32 path (tight tolerance).
    out_f32 = jax.block_until_ready(dnn5_forward(x, params, mxu_dtype=jnp.float32))
    assert jnp.allclose(out_f32, ref, atol=1e-4, rtol=1e-4), (
        f"f32 max abs err = {jnp.max(jnp.abs(out_f32 - ref))}"
    )

    # Ragged larger batch exercising partial blocks (no wrapper pad) and the
    # generation-aware multi-step grid.
    x_big = jax.random.normal(kx2, (1031, in_feat_num), jnp.float32)
    out_big = jax.block_until_ready(
        dnn5_forward(x_big, params, mxu_dtype=jnp.float32))
    ref_big = dnn5_reference(x_big, params)
    assert out_big.shape == (1031, 1), out_big.shape
    assert jnp.allclose(out_big, ref_big, atol=1e-4, rtol=1e-4), (
        f"big max abs err = {jnp.max(jnp.abs(out_big - ref_big))}"
    )

    print("KERNEL_OK")
</pallas_src>

<mosaic_0001>
module attributes {stable_mosaic.version = 11 : i64} {
  func.func @_dnn5_kernel(%arg0: i32, %arg1: memref<128x32xf32, #tpu.memory_space<vmem>>, %arg2: memref<64x32xbf16, #tpu.memory_space<vmem>>, %arg3: memref<64x1xf32, #tpu.memory_space<vmem>>, %arg4: memref<32x64xbf16, #tpu.memory_space<vmem>>, %arg5: memref<32x1xf32, #tpu.memory_space<vmem>>, %arg6: memref<16x32xbf16, #tpu.memory_space<vmem>>, %arg7: memref<16x1xf32, #tpu.memory_space<vmem>>, %arg8: memref<8x16xbf16, #tpu.memory_space<vmem>>, %arg9: memref<8x1xf32, #tpu.memory_space<vmem>>, %arg10: memref<8x1xf32, #tpu.memory_space<vmem>>, %arg11: memref<1x1xf32, #tpu.memory_space<vmem>>, %arg12: memref<1x128xf32, #tpu.memory_space<vmem>>) attributes {dimension_semantics = [#tpu.dimension_semantics<parallel>], iteration_bounds = array<i64: 1>, scalar_prefetch = 0 : i64, scratch_operands = 0 : i64, tpu.core_type = #tpu.core_type<tc>, window_params = [{transform_indices = @transform_0, window_bounds = array<i64: 128, 32>}, {pipeline_mode = #tpu.pipeline_mode<synchronous>, transform_indices = @transform_1, window_bounds = array<i64: 64, 32>}, {pipeline_mode = #tpu.pipeline_mode<synchronous>, transform_indices = @transform_2, window_bounds = array<i64: 64, 1>}, {pipeline_mode = #tpu.pipeline_mode<synchronous>, transform_indices = @transform_3, window_bounds = array<i64: 32, 64>}, {pipeline_mode = #tpu.pipeline_mode<synchronous>, transform_indices = @transform_4, window_bounds = array<i64: 32, 1>}, {pipeline_mode = #tpu.pipeline_mode<synchronous>, transform_indices = @transform_5, window_bounds = array<i64: 16, 32>}, {pipeline_mode = #tpu.pipeline_mode<synchronous>, transform_indices = @transform_6, window_bounds = array<i64: 16, 1>}, {pipeline_mode = #tpu.pipeline_mode<synchronous>, transform_indices = @transform_7, window_bounds = array<i64: 8, 16>}, {pipeline_mode = #tpu.pipeline_mode<synchronous>, transform_indices = @transform_8, window_bounds = array<i64: 8, 1>}, {pipeline_mode = #tpu.pipeline_mode<synchronous>, transform_indices = @transform_9, window_bounds = array<i64: 8, 1>}, {pipeline_mode = #tpu.pipeline_mode<synchronous>, transform_indices = @transform_10, window_bounds = array<i64: 1, 1>}, {transform_indices = @transform_11, window_bounds = array<i64: 1, 128>}]} {
    %c0 = arith.constant 0 : index
    %c0_0 = arith.constant 0 : index
    %0 = vector.load %arg1[%c0, %c0_0] : memref<128x32xf32, #tpu.memory_space<vmem>>, vector<128x32xf32>
    %1 = arith.truncf %0 : vector<128x32xf32> to vector<128x32xbf16>
    %c0_1 = arith.constant 0 : index
    %c0_2 = arith.constant 0 : index
    %2 = vector.load %arg2[%c0_1, %c0_2] : memref<64x32xbf16, #tpu.memory_space<vmem>>, vector<64x32xbf16>
    %cst = arith.constant dense<0.000000e+00> : vector<64x128xf32>
    %3 = tpu.matmul %2, %1, %cst {dimension_numbers = #tpu.dot_dimension_numbers<[1], [1], [0], [0], [0, 0, 1, 0], [], []>} : vector<64x32xbf16>, vector<128x32xbf16>, vector<64x128xf32> -> vector<64x128xf32>
    %c0_3 = arith.constant 0 : index
    %c0_4 = arith.constant 0 : index
    %4 = vector.load %arg3[%c0_3, %c0_4] : memref<64x1xf32, #tpu.memory_space<vmem>>, vector<64x1xf32>
    %5 = vector.broadcast %4 : vector<64x1xf32> to vector<64x128xf32>
    %6 = arith.addf %3, %5 : vector<64x128xf32>
    %cst_5 = arith.constant 0.000000e+00 : f32
    %7 = vector.broadcast %cst_5 : f32 to vector<64x128xf32>
    %8 = arith.maximumf %6, %7 : vector<64x128xf32>
    %c0_6 = arith.constant 0 : index
    %c0_7 = arith.constant 0 : index
    %9 = vector.load %arg4[%c0_6, %c0_7] : memref<32x64xbf16, #tpu.memory_space<vmem>>, vector<32x64xbf16>
    %10 = arith.truncf %8 : vector<64x128xf32> to vector<64x128xbf16>
    %cst_8 = arith.constant dense<0.000000e+00> : vector<32x128xf32>
    %11 = tpu.matmul %9, %10, %cst_8 {dimension_numbers = #tpu.dot_dimension_numbers<[1], [0], [0], [1], [0, 0, 1, 1], [], []>} : vector<32x64xbf16>, vector<64x128xbf16>, vector<32x128xf32> -> vector<32x128xf32>
    %c0_9 = arith.constant 0 : index
    %c0_10 = arith.constant 0 : index
    %12 = vector.load %arg5[%c0_9, %c0_10] : memref<32x1xf32, #tpu.memory_space<vmem>>, vector<32x1xf32>
    %13 = vector.broadcast %12 : vector<32x1xf32> to vector<32x128xf32>
    %14 = arith.addf %11, %13 : vector<32x128xf32>
    %cst_11 = arith.constant 0.000000e+00 : f32
    %15 = vector.broadcast %cst_11 : f32 to vector<32x128xf32>
    %16 = arith.maximumf %14, %15 : vector<32x128xf32>
    %c0_12 = arith.constant 0 : index
    %c0_13 = arith.constant 0 : index
    %17 = vector.load %arg6[%c0_12, %c0_13] : memref<16x32xbf16, #tpu.memory_space<vmem>>, vector<16x32xbf16>
    %18 = arith.truncf %16 : vector<32x128xf32> to vector<32x128xbf16>
    %cst_14 = arith.constant dense<0.000000e+00> : vector<16x128xf32>
    %19 = tpu.matmul %17, %18, %cst_14 {dimension_numbers = #tpu.dot_dimension_numbers<[1], [0], [0], [1], [0, 0, 1, 1], [], []>} : vector<16x32xbf16>, vector<32x128xbf16>, vector<16x128xf32> -> vector<16x128xf32>
    %c0_15 = arith.constant 0 : index
    %c0_16 = arith.constant 0 : index
    %20 = vector.load %arg7[%c0_15, %c0_16] : memref<16x1xf32, #tpu.memory_space<vmem>>, vector<16x1xf32>
    %21 = vector.broadcast %20 : vector<16x1xf32> to vector<16x128xf32>
    %22 = arith.addf %19, %21 : vector<16x128xf32>
    %cst_17 = arith.constant 0.000000e+00 : f32
    %23 = vector.broadcast %cst_17 : f32 to vector<16x128xf32>
    %24 = arith.maximumf %22, %23 : vector<16x128xf32>
    %c0_18 = arith.constant 0 : index
    %c0_19 = arith.constant 0 : index
    %25 = vector.load %arg8[%c0_18, %c0_19] : memref<8x16xbf16, #tpu.memory_space<vmem>>, vector<8x16xbf16>
    %26 = arith.truncf %24 : vector<16x128xf32> to vector<16x128xbf16>
    %cst_20 = arith.constant dense<0.000000e+00> : vector<8x128xf32>
    %27 = tpu.matmul %25, %26, %cst_20 {dimension_numbers = #tpu.dot_dimension_numbers<[1], [0], [0], [1], [0, 0, 1, 1], [], []>} : vector<8x16xbf16>, vector<16x128xbf16>, vector<8x128xf32> -> vector<8x128xf32>
    %c0_21 = arith.constant 0 : index
    %c0_22 = arith.constant 0 : index
    %28 = vector.load %arg9[%c0_21, %c0_22] : memref<8x1xf32, #tpu.memory_space<vmem>>, vector<8x1xf32>
    %29 = vector.broadcast %28 : vector<8x1xf32> to vector<8x128xf32>
    %30 = arith.addf %27, %29 : vector<8x128xf32>
    %cst_23 = arith.constant 0.000000e+00 : f32
    %31 = vector.broadcast %cst_23 : f32 to vector<8x128xf32>
    %32 = arith.maximumf %30, %31 : vector<8x128xf32>
    %c0_24 = arith.constant 0 : index
    %c0_25 = arith.constant 0 : index
    %33 = vector.load %arg10[%c0_24, %c0_25] : memref<8x1xf32, #tpu.memory_space<vmem>>, vector<8x1xf32>
    %34 = vector.broadcast %33 : vector<8x1xf32> to vector<8x128xf32>
    %35 = arith.mulf %32, %34 : vector<8x128xf32>
    %cst_26 = arith.constant dense<0.000000e+00> : vector<128xf32>
    %36 = vector.multi_reduction <add>, %35, %cst_26 [0] : vector<8x128xf32> to vector<128xf32>
    %37 = vector.shape_cast %36 : vector<128xf32> to vector<1x128xf32>
    %c0_27 = arith.constant 0 : index
    %c0_28 = arith.constant 0 : index
    %38 = vector.load %arg11[%c0_27, %c0_28] : memref<1x1xf32, #tpu.memory_space<vmem>>, vector<1x1xf32>
    %39 = vector.broadcast %38 : vector<1x1xf32> to vector<1x128xf32>
    %40 = arith.addf %37, %39 : vector<1x128xf32>
    %c0_29 = arith.constant 0 : index
    %c0_30 = arith.constant 0 : index
    %41 = vector.load %arg12[%c0_29, %c0_30] : memref<1x128xf32, #tpu.memory_space<vmem>>, vector<1x128xf32>
    tpu.vector_store %arg12[%c0_29, %c0_30], %40 {strides = array<i32>} : memref<1x128xf32, #tpu.memory_space<vmem>>, vector<1x128xf32>,
    return
  }
  func.func @transform_0(%arg0: i32) -> (i32, i32) {
    %c0_i32 = arith.constant 0 : i32
    %c0_i32_0 = arith.constant 0 : i32
    return %arg0, %c0_i32 : i32, i32
  }
  func.func @transform_1(%arg0: i32) -> (i32, i32) {
    %c0_i32 = arith.constant 0 : i32
    %c0_i32_0 = arith.constant 0 : i32
    %c0_i32_1 = arith.constant 0 : i32
    return %c0_i32, %c0_i32_0 : i32, i32
  }
  func.func @transform_2(%arg0: i32) -> (i32, i32) {
    %c0_i32 = arith.constant 0 : i32
    %c0_i32_0 = arith.constant 0 : i32
    %c0_i32_1 = arith.constant 0 : i32
    return %c0_i32, %c0_i32_0 : i32, i32
  }
  func.func @transform_3(%arg0: i32) -> (i32, i32) {
    %c0_i32 = arith.constant 0 : i32
    %c0_i32_0 = arith.constant 0 : i32
    %c0_i32_1 = arith.constant 0 : i32
    return %c0_i32, %c0_i32_0 : i32, i32
  }
  func.func @transform_4(%arg0: i32) -> (i32, i32) {
    %c0_i32 = arith.constant 0 : i32
    %c0_i32_0 = arith.constant 0 : i32
    %c0_i32_1 = arith.constant 0 : i32
    return %c0_i32, %c0_i32_0 : i32, i32
  }
  func.func @transform_5(%arg0: i32) -> (i32, i32) {
    %c0_i32 = arith.constant 0 : i32
    %c0_i32_0 = arith.constant 0 : i32
    %c0_i32_1 = arith.constant 0 : i32
    return %c0_i32, %c0_i32_0 : i32, i32
  }
  func.func @transform_6(%arg0: i32) -> (i32, i32) {
    %c0_i32 = arith.constant 0 : i32
    %c0_i32_0 = arith.constant 0 : i32
    %c0_i32_1 = arith.constant 0 : i32
    return %c0_i32, %c0_i32_0 : i32, i32
  }
  func.func @transform_7(%arg0: i32) -> (i32, i32) {
    %c0_i32 = arith.constant 0 : i32
    %c0_i32_0 = arith.constant 0 : i32
    %c0_i32_1 = arith.constant 0 : i32
    return %c0_i32, %c0_i32_0 : i32, i32
  }
  func.func @transform_8(%arg0: i32) -> (i32, i32) {
    %c0_i32 = arith.constant 0 : i32
    %c0_i32_0 = arith.constant 0 : i32
    %c0_i32_1 = arith.constant 0 : i32
    return %c0_i32, %c0_i32_0 : i32, i32
  }
  func.func @transform_9(%arg0: i32) -> (i32, i32) {
    %c0_i32 = arith.constant 0 : i32
    %c0_i32_0 = arith.constant 0 : i32
    %c0_i32_1 = arith.constant 0 : i32
    return %c0_i32, %c0_i32_0 : i32, i32
  }
  func.func @transform_10(%arg0: i32) -> (i32, i32) {
    %c0_i32 = arith.constant 0 : i32
    %c0_i32_0 = arith.constant 0 : i32
    %c0_i32_1 = arith.constant 0 : i32
    return %c0_i32, %c0_i32_0 : i32, i32
  }
  func.func @transform_11(%arg0: i32) -> (i32, i32) {
    %c0_i32 = arith.constant 0 : i32
    %c0_i32_0 = arith.constant 0 : i32
    return %c0_i32, %arg0 : i32, i32
  }
}

</mosaic_0001>

<bundles_post_ra>
// kernel: tpu_custom_call.1
= control target key start
LH: loop header
LB: loop body
LE: loop exit
PB: predicated region body
PF: predicated region fallthrough
CT: control target
= control target key end

     0   :  { %s859_s0 = inlined_call_operand.vmem [shape: f32[16,32], index: 0, kind: input, shape index: {}]   ;;  %s860_s1 = inlined_call_operand.vmem [shape: bf16[64,32], index: 1, kind: input, shape index: {}]   ;;  %s861_s2 = inlined_call_operand.vmem [shape: f32[64,1], index: 2, kind: input, shape index: {}]   ;;  %s862_s3 = inlined_call_operand.vmem [shape: bf16[32,64], index: 3, kind: input, shape index: {}]   ;;  %s863_s4 = inlined_call_operand.vmem [shape: f32[32,1], index: 4, kind: input, shape index: {}]   ;;  %s864_s5 = inlined_call_operand.vmem [shape: bf16[16,32], index: 5, kind: input, shape index: {}]   ;;  %s865_s6 = inlined_call_operand.vmem [shape: f32[16,1], index: 6, kind: input, shape index: {}]   ;;  %s866_s7 = inlined_call_operand.vmem [shape: bf16[8,16], index: 7, kind: input, shape index: {}]   ;;  %s867_s8 = inlined_call_operand.vmem [shape: f32[8,1], index: 8, kind: input, shape index: {}]   ;;  %s868_s9 = inlined_call_operand.vmem [shape: f32[8,1], index: 9, kind: input, shape index: {}]   ;;  %s869_s10 = inlined_call_operand.<no memory space> [shape: f32[1,1], index: 10, kind: input, shape index: {}]   ;;  %s870_s11 = inlined_call_operand.hbm [shape: f32[1,16], index: 11, kind: output, shape index: {}]  }
   0x1   :  { %v16_v0 = vstv %s869_s10 }
   0x2   :  { %17 = vst [vmem:[#allocation2] sm:$0x1] %v16_v0 }
   0x3   :  { %v56_v1 = vld [vmem:[%s859_s0 + $0x70] sm:$0xff]  ;;  %v57_v2 = vld [vmem:[%s859_s0 + $0x78] sm:$0xff]  ;;  %vm142_vm0 = vcmask 261120   ;;  %v54_v3 = vld [vmem:[%s859_s0 + $0x60] sm:$0xff]  ;;  %v644_v6 = vmov 0  }
   0x4   :  { %v65_v4 = vpack.c.bf16 %v57_v2, %v56_v1  ;;  %v55_v5 = vld [vmem:[%s859_s0 + $0x68] sm:$0xff]  ;;  %613 = vset.pattern.permute.xlu0 %v644_v6  ;;  %614 = vset.pattern.permute.xlu1 %v644_v6  ;;  %v52_v9 = vld [vmem:[%s859_s0 + $0x50] sm:$0xff]  ;;  %v53_v10 = vld [vmem:[%s859_s0 + $0x58] sm:$0xff] }
   0x5   :  { %v64_v7 = vpack.c.bf16 %v55_v5, %v54_v3  ;;  %v615_v11 = vld [vmem:[%s860_s1] sm:$0xff]   ;;  %v63_v13 = vpack.c.bf16 %v53_v10, %v52_v9  ;;  %v80_v14 = vld [vmem:[%s861_s2 + $0x30] sm:$0xff]  ;;  %v81_v16 = vld [vmem:[%s861_s2 + $0x38] sm:$0xff] }
   0x6   :  { %601 = vmatprep.subr.msk.bf16.mxu0 %vm142_vm0, %v65_v4  ;;  %v177_v8 = vsel %vm142_vm0, %v65_v4, 0  ;;  %567 = vmatprep.mubr.msk.bf16.mxu0 %vm142_vm0, %v615_v11  ;;  %v78_v15 = vld [vmem:[%s861_s2 + $0x20] sm:$0xff]  ;;  %v79_v17 = vld [vmem:[%s861_s2 + $0x28] sm:$0xff]  ;;  %v76_v20 = vld [vmem:[%s861_s2 + $0x10] sm:$0xff] }
   0x7   :  { %552 = vmatpush3.bf16.xpose.msra.mxu0 %v177_v8  ;;  %v174_v12 = vsel %vm142_vm0, %v64_v7, 0  ;;  %114 = vperm.xlu0 %613, %v80_v14   ;;  %v50_v18 = vld [vmem:[%s859_s0 + $0x40] sm:$0xff]  ;;  %v51_v19 = vld [vmem:[%s859_s0 + $0x48] sm:$0xff]  ;;  %v77_v21 = vld [vmem:[%s861_s2 + $0x18] sm:$0xff]  ;;  %v171_v22 = vsel %vm142_vm0, %v63_v13, 0 }
   0x8   :  { %602 = vmatprep.subr.msk.bf16.mxu0 %vm142_vm0, %v64_v7  ;;  %104 = vperm.xlu1 %614, %v78_v15   ;;  %v62_v23 = vpack.c.bf16 %v51_v19, %v50_v18 }
   0xb   :  { %119 = vperm.xlu0 %613, %v81_v16  }
   0xc   :  { %109 = vperm.xlu1 %614, %v79_v17  }
   0xf   :  { %554 = vmatpush3.bf16.xpose.msra.mxu0 %v174_v12 }
  0x10   :  { %603 = vmatprep.subr.msk.bf16.mxu0 %vm142_vm0, %v63_v13 }
  0x11   :  { %18 = vsyncpa [#allocation4], 0  ;;  %94 = vperm.xlu0 %613, %v76_v20   ;;  %v74_v24 = vld [vmem:[%s861_s2] sm:$0xff]  ;;  %99 = vperm.xlu1 %614, %v77_v21   ;;  %v75_v25 = vld [vmem:[%s861_s2 + $0x8] sm:$0xff]  ;;  %v168_v30 = vsel %vm142_vm0, %v62_v23, 0  ;;  %vm294_vm1 = vcmask 523264  }
  0x12   :  { %v48_v26 = vld [vmem:[%s859_s0 + $0x30] sm:$0xff]  ;;  %v49_v27 = vld [vmem:[%s859_s0 + $0x38] sm:$0xff]  ;;  %v260_v32 = vld [vmem:[%s863_s4] sm:$0xff]  ;;  %vm646_vm2 = vmmov 0   ;;  %vm429_vm3 = vcmask 130048  }
  0x13   :  { %v262_v28 = vld [vmem:[%s863_s4 + $0x10] sm:$0xff]  ;;  %v263_v29 = vld [vmem:[%s863_s4 + $0x18] sm:$0xff]  ;;  %v61_v31 = vpack.c.bf16 %v49_v27, %v48_v26  ;;  %v261_v33 = vld [vmem:[%s863_s4 + $0x8] sm:$0xff] }
  0x14   :  { %v46_v34 = vld [vmem:[%s859_s0 + $0x20] sm:$0xff]  ;;  %v47_v35 = vld [vmem:[%s859_s0 + $0x28] sm:$0xff]  ;;  %v44_v42 = vld [vmem:[%s859_s0 + $0x10] sm:$0xff] }
  0x15   :  { %84 = vperm.xlu0 %613, %v74_v24   ;;  %89 = vperm.xlu1 %614, %v75_v25   ;;  %v358_v36 = vld [vmem:[%s865_s6] sm:$0xff]  ;;  %v359_v37 = vld [vmem:[%s865_s6 + $0x8] sm:$0xff]  ;;  %v165_v38 = vsel %vm142_vm0, %v61_v31, 0  ;;  %v60_v39 = vpack.c.bf16 %v47_v35, %v46_v34  ;;  %v45_v43 = vld [vmem:[%s859_s0 + $0x18] sm:$0xff] }
  0x16   :  { %v423_v40 = vld [vmem:[%s867_s8] sm:$0xff]  ;;  %v59_v46 = vpack.c.bf16 %v45_v43, %v44_v42  ;;  %v43_v48 = vld [vmem:[%s859_s0 + $0x8] sm:$0xff]  ;;  %v617_v53 = vld [vmem:[%s860_s1 + $0x10] sm:$0xff]  }
  0x17   :  { %556 = vmatpush3.bf16.xpose.msra.mxu0 %v171_v22  ;;  %v474_v41 = vld [vmem:[%s868_s9] sm:$0xff]  ;;  %v162_v45 = vsel %vm142_vm0, %v60_v39, 0  ;;  %v616_v52 = vld [vmem:[%s860_s1 + $0x8] sm:$0xff]   ;;  %v618_v54 = vld [vmem:[%s860_s1 + $0x18] sm:$0xff]  }
  0x18   :  { %604 = vmatprep.subr.msk.bf16.mxu0 %vm142_vm0, %v62_v23  ;;  %v487_v44 = vld [vmem:[#allocation2] sm:$0x1]  ;;  %v159_v49 = vsel %vm142_vm0, %v59_v46, 0 }
  0x19   :  { %276 = vperm.xlu0 %613, %v262_v28   ;;  %281 = vperm.xlu1 %614, %v263_v29   ;;  %v42_v47 = vld [vmem:[%s859_s0] sm:$0xff]  ;;  %v620_v28 = vld [vmem:[%s862_s3 + $0x8] sm:$0xff]   ;;  %v645_v29 = vmov 0.0  }
  0x1a   :  { %v58_v50 = vpack.c.bf16 %v43_v48, %v42_v47  ;;  %v619_v55 = vld [vmem:[%s862_s3] sm:$0xff]  }
  0x1b   :  { %583 = vmatprep.mubr.msk.bf16.mxu1 %vm294_vm1, %v619_v55  ;;  %v621_v48 = vld [vmem:[%s864_s5] sm:$0xff]  }
  0x1c   :  { %v156_v51 = vsel %vm142_vm0, %v58_v50, 0 }
  0x1d   :  { %266 = vperm.xlu0 %613, %v260_v32   ;;  %271 = vperm.xlu1 %614, %v261_v33  }
  0x1f   :  { %558 = vmatpush3.bf16.xpose.msra.mxu0 %v168_v30 }
  0x20   :  { %605 = vmatprep.subr.msk.bf16.mxu0 %vm142_vm0, %v61_v31 }
  0x21   :  { %362 = vperm.xlu0 %613, %v358_v36   ;;  %367 = vperm.xlu1 %614, %v359_v37  }
  0x25   :  { %426 = vperm.xlu0 %613, %v423_v40   ;;  %477 = vperm.xlu1 %614, %v474_v41  }
  0x27   :  { %560 = vmatpush3.bf16.xpose.msra.mxu0 %v165_v38 }
  0x28   :  { %606 = vmatprep.subr.msk.bf16.mxu0 %vm142_vm0, %v60_v39 }
  0x29   :  { %490 = vperm.xlu0 %613, %v487_v44  }
  0x2f   :  { %562 = vmatpush3.bf16.xpose.msra.mxu0 %v162_v45 }
  0x30   :  { %607 = vmatprep.subr.msk.bf16.mxu0 %vm142_vm0, %v59_v46 }
  0x37   :  { %564 = vmatpush3.bf16.xpose.msra.mxu0 %v159_v49 }
  0x38   :  { %608 = vmatprep.subr.msk.bf16.mxu0 %vm142_vm0, %v58_v50 }
  0x3f   :  { %566 = vmatpush3.bf16.xpose.msra.mxu0 %v156_v51 }
  0x46   :  { %568 = vmatmul.mubr.msk.bf16.vlgmr.msra.gmra.mxu0 %vm142_vm0, %v616_v52 }
  0x47   :  { %571 = vmatprep.mubr.msk.bf16.mxu0 %vm142_vm0, %v617_v53 }
  0x4e   :  { %572 = vmatmul.mubr.msk.bf16.gmra.mxu0 %vm142_vm0, %v618_v54 }
  0x82   :  { %v115_v58 = vpop.permute.xlu0 %114 }
  0x83   :  { %v105_v56 = vpop.permute.xlu1 %104 }
  0x86   :  { %v120_v63 = vpop.permute.xlu0 %119 }
  0x87   :  { %v110_v61 = vpop.permute.xlu1 %109 }
  0x8c   :  { %v100_v3 = vpop.permute.xlu1 %99  ;;  %v95_v7 = vpop.permute.xlu0 %94 }
  0x90   :  { %v90_v17 = vpop.permute.xlu1 %89  ;;  %v85_v21 = vpop.permute.xlu0 %84 }
  0x94   :  { %v277_v30 = vpop.permute.xlu0 %276  ;;  %v282_v31 = vpop.permute.xlu1 %281 }
  0x98   :  { %v267_v36 = vpop.permute.xlu0 %266  ;;  %v272_v38 = vpop.permute.xlu1 %271 }
  0x9c   :  { %v363_v50 = vpop.permute.xlu0 %362  ;;  %v368_v53 = vpop.permute.xlu1 %367 }
 0x106   :  { %v569_v57 = vpop.f32.mrf.mxu0 }
 0x107   :  { %v222_v13 = vadd.f32 %v569_v57, %v95_v7 }
 0x108   :  { %v213_v59 = vpop.f32.mrf.mxu0 }
 0x109   :  { %v246_v22 = vmax.f32 %v222_v13, 0.0  ;;  %v214_v23 = vadd.f32 %v213_v59, %v85_v21 }
 0x10a   :  { %v570_v60 = vpop.f32.mrf.mxu0 }
 0x10b   :  { %v225_v9 = vadd.f32 %v570_v60, %v100_v3  ;;  %v244_v26 = vmax.f32 %v214_v23, 0.0  ;;  %v421_v60 = vld [vmem:[%s866_s7] sm:$0xf]  ;;  %s647_s7 = smov [#allocation3]  }
 0x10c   :  { %v216_v62 = vpop.f32.mrf.mxu0  ;;  %s505_s28 = sshll.u32 %s647_s7, 4  ;;  %s506_s28 = int_to_ptr.vmem [resolvable:$true] %s505_s28 }
 0x10d   :  { %v247_v18 = vmax.f32 %v225_v9, 0.0  ;;  %v217_v19 = vadd.f32 %v216_v62, %v90_v17  ;;  %s622_s29 = scalar_lea.vmem %s506_s28, 16  ;;  %s626_s30 = scalar_lea.vmem %s506_s28, 32 }
 0x10e   :  { %v573_v0 = vpop.f32.mrf.mxu0  ;;  %p623_p0 = scmp.ne.s32.totalorder %s506_s28, %s622_s29  ;;  %p627_p1 = scmp.lt.s32.totalorder %s506_s28, %s506_s28 }
 0x10f   :  { %v238_v2 = vadd.f32 %v573_v0, %v115_v58  ;;  %v257_v24 = vpack.c.bf16 %v247_v18, %v246_v22  ;;  %v245_v25 = vmax.f32 %v217_v19, 0.0  ;;  %p628_p2 = scmp.lt.s32.totalorder %s626_s30, %s622_s29 }
 0x110   :  { %v229_v1 = vpop.f32.mrf.mxu0 }
 0x111   :  { %v230_v5 = vadd.f32 %v229_v1, %v105_v56  ;;  %v250_v10 = vmax.f32 %v238_v2, 0.0  ;;  %v256_v27 = vpack.c.bf16 %v245_v25, %v244_v26  ;;  %v478_v2 = vpop.permute.xlu1 %477  ;;  %p629_p3 = por %p628_p2, %p627_p1 }
 0x112   :  { %v574_v4 = vpop.f32.mrf.mxu0 }
 0x113   :  { %v241_v6 = vadd.f32 %v574_v4, %v120_v63  ;;  %v248_v14 = vmax.f32 %v230_v5, 0.0  ;;  %v493_v4 = vlaneseq  ;;  %p630_p4 = pnand %p629_p3, %p623_p0 }
 0x114   :  { %v232_v8 = vpop.f32.mrf.mxu0 }
 0x115   :  { %v251_v11 = vmax.f32 %v241_v6, 0.0  ;;  %v233_v12 = vadd.f32 %v232_v8, %v110_v61  ;;  %v427_v61 = vpop.permute.xlu0 %426  ;;  %v494_v8 = vshrl.u32 %v493_v4, 7 }
 0x117   :  { %v249_v15 = vmax.f32 %v233_v12, 0.0  ;;  %v259_v16 = vpack.c.bf16 %v251_v11, %v250_v10  ;;  %v495_v11 = vsub.s32 0, %v494_v8 }
 0x119   :  { %v258_v20 = vpack.c.bf16 %v249_v15, %v248_v14  ;;  %575 = vmatprep.subr.bf16.mxu1 %v259_v16  ;;  %v491_v13 = vpop.permute.xlu0 %490 }
 0x11a   :  { %576 = vmatpush3.bf16.msra.mxu1 %v259_v16  ;;  %v496_v15 = vrot.slane %v491_v13, %v495_v11 }
 0x11b   :  { %577 = vmatprep.subr.bf16.mxu1 %v258_v20 }
 0x11e   :  { %578 = vmatpush3.bf16.msra.mxu1 %v258_v20 }
 0x11f   :  { %579 = vmatprep.subr.bf16.mxu1 %v257_v24 }
 0x122   :  { %580 = vmatpush3.bf16.msra.mxu1 %v257_v24 }
 0x123   :  { %581 = vmatprep.subr.bf16.mxu1 %v256_v27 }
 0x126   :  { %582 = vmatpush3.bf16.msra.mxu1 %v256_v27 }
 0x127   :  { %587 = vmatprep.subr.bf16.mxu1 %v645_v29 }
 0x129   :  { %584 = vmatmul.mubr.msk.bf16.vlgmr.msra.gmra.mxu1 %vm294_vm1, %v620_v28 }
 0x12a   :  { %591 = vmatprep.mubr.msk.bf16.mxu1 %vm646_vm2, %v645_v29 }
 0x1e9   :  { %v585_v32 = vpop.f32.mrf.mxu1 }
 0x1ea   :  { %v344_v34 = vadd.f32 %v585_v32, %v277_v30 }
 0x1eb   :  { %v335_v33 = vpop.f32.mrf.mxu1 }
 0x1ec   :  { %v352_v40 = vmax.f32 %v344_v34, 0.0  ;;  %v336_v41 = vadd.f32 %v335_v33, %v267_v36 }
 0x1ed   :  { %v586_v35 = vpop.f32.mrf.mxu1 }
 0x1ee   :  { %v347_v37 = vadd.f32 %v586_v35, %v282_v31  ;;  %v350_v46 = vmax.f32 %v336_v41, 0.0 }
 0x1ef   :  { %v338_v39 = vpop.f32.mrf.mxu1 }
 0x1f0   :  { %v353_v42 = vmax.f32 %v347_v37, 0.0  ;;  %v339_v43 = vadd.f32 %v338_v39, %v272_v38 }
 0x1f2   :  { %v357_v44 = vpack.c.bf16 %v353_v42, %v352_v40  ;;  %v351_v45 = vmax.f32 %v339_v43, 0.0 }
 0x1f4   :  { %588 = vmatpush3.bf16.msra.mxu1 %v357_v44  ;;  %v356_v47 = vpack.c.bf16 %v351_v45, %v350_v46 }
 0x1f5   :  { %589 = vmatprep.subr.bf16.mxu1 %v645_v29 }
 0x1f8   :  { %590 = vmatpush3.bf16.msra.mxu1 %v356_v47 }
 0x1f9   :  { %595 = vmatprep.subr.bf16.mxu1 %v645_v29 }
 0x1fb   :  { %592 = vmatmul.mubr.msk.bf16.vlgmr.msra.gmra.mxu1 %vm142_vm0, %v621_v48 }
 0x1fc   :  { %597 = vmatprep.mubr.msk.bf16.mxu1 %vm646_vm2, %v645_v29 }
 0x2bb   :  { %v412_v49 = vpop.f32.mrf.mxu1 }
 0x2bc   :  { %v413_v52 = vadd.f32 %v412_v49, %v363_v50 }
 0x2bd   :  { %v593_v51 = vpop.f32.mrf.mxu1 }
 0x2be   :  { %v419_v57 = vmax.f32 %v413_v52, 0.0 }
 0x2bf   :  { %v415_v54 = vpop.f32.mrf.mxu1 }
 0x2c0   :  { %v416_v55 = vadd.f32 %v415_v54, %v368_v53 }
 0x2c1   :  { %v594_v56 = vpop.f32.mrf.mxu1 }
 0x2c2   :  { %v420_v58 = vmax.f32 %v416_v55, 0.0 }
 0x2c4   :  { %v422_v59 = vpack.c.bf16 %v420_v58, %v419_v57 }
 0x2c6   :  { %596 = vmatpush3.bf16.msra.mxu1 %v422_v59 }
 0x2c9   :  { %598 = vmatmul.mubr.msk.bf16.vlgmr.msra.gmra.mxu1 %vm429_vm3, %v421_v60 }
 0x389   :  { %v467_v62 = vpop.f32.mrf.mxu1 }
 0x38a   :  { %v468_v63 = vadd.f32 %v467_v62, %v427_v61 }
 0x38b   :  { %v599_v0 = vpop.f32.mrf.mxu1 }
 0x38c   :  { %v473_v1 = vmax.f32 %v468_v63, 0.0 }
 0x38d   :  { %v470_v3 = vpop.f32.mrf.mxu1 }
 0x38e   :  { %v480_v5 = vmul.f32 %v478_v2, %v473_v1 }
 0x38f   :  { %v600_v6 = vpop.f32.mrf.mxu1 }
 0x390   :  { %v481_v7 = vrot.slane %v480_v5, 4 }
 0x392   :  { %v482_v9 = vadd.f32 %v481_v7, %v480_v5 }
 0x394   :  { %v483_v10 = vrot.slane %v482_v9, 2 }
 0x396   :  { %v484_v12 = vadd.f32 %v483_v10, %v482_v9 }
 0x398   :  { %v485_v14 = vrot.slane %v484_v12, 1 }
 0x39a   :  { %v486_v16 = vadd.f32 %v485_v14, %v484_v12 }
 0x39c   :  { %v497_v17 = vadd.f32 %v496_v15, %v486_v16 }
 0x39e   :  { %498 = vst [vmem:[#allocation3] sm:$0x1] %v497_v17 }
 0x39f   :  { %633 = shalt.err (!%p630_p4)
}
 0x3a0   :  { %508 = dma.vmem_to_hbm [thread:$0]  %s506_s28, 16, %s870_s11, [#allocation4]  }
 0x3a1   :  { %642 = dma.done.wait [#allocation4], 16  }
 0x3a2   :  { %643 = vsyncadd [#allocation4], 4294967280 }
 0x3a3   :  { %512 = vsyncpa [#allocation4], 1 }

</bundles_post_ra>
